<compile_context>
chip_gen: v7x
topology: tpu7x:2x2x1
jax: 0.10.0
libtpu: 0.0.40
codegen_flags: <defaults>
</compile_context>

<pallas_src>
import jax
import jax.numpy as jnp
from jax.experimental import pallas as pl
from jax.experimental.pallas import tpu as pltpu


def _round_up(a, m):
    return (a + m - 1) // m * m


def _ffn_kernel(x_ref, w1_ref, b1_ref, w2_ref, b2_ref, g_ref, beta_ref,
                seg_ref, o_ref):
    # x tile: (TM, L) packed rows.  Parameters have constant index_maps, so
    # they stay resident in VMEM across grid steps (no re-DMA).
    x = x_ref[...]

    # w_1 (block-diagonal): (TM, L) @ (L, LH), bias + relu        (MXU + VPU)
    h = jnp.dot(x, w1_ref[...], preferred_element_type=jnp.float32)
    h = jnp.maximum(h + b1_ref[...], 0.0)

    # w_2 (block-diagonal): (TM, LH) @ (LH, L), bias + residual   (MXU + VPU)
    y = jnp.dot(h, w2_ref[...], preferred_element_type=jnp.float32)
    # TODO(synk): nn.Dropout(0.1) is identity in eval mode; training-mode RNG
    #             dropout is not implemented here.
    y = y + b2_ref[...] + x.astype(jnp.float32)   # residual add in f32

    # LayerNorm over each d_in-wide lane segment, eps=1e-6, biased variance.
    # seg_ref = kron(I_pack, ones(d_in, d_in)/d_in): one MXU matmul per
    # statistic both reduces each segment and broadcasts the result back over
    # its lanes, replacing two XLU cross-lane reductions.
    mean = jnp.dot(y, seg_ref[...], preferred_element_type=jnp.float32)
    ex2 = jnp.dot(y * y, seg_ref[...], preferred_element_type=jnp.float32)
    var = jnp.maximum(ex2 - mean * mean, 0.0)     # guard tiny negative roundoff
    out = (y - mean) * jax.lax.rsqrt(var + 1e-6) * g_ref[...] + beta_ref[...]

    o_ref[...] = out.astype(o_ref.dtype)


def positionwise_feed_forward(x, w1, b1, w2, b2, gamma, beta, *,
                              tile_packed_rows=256):
    """x: (B, T, d_in). w1: (d_in, d_hid), w2: (d_hid, d_in) (pre-transposed)."""
    B, T, d_in = x.shape
    d_hid = w1.shape[1]
    rows = B * T

    # Pack consecutive rows so the last (lane) dim is 128-wide when possible.
    pack = 128 // d_in if (d_in <= 128 and 128 % d_in == 0) else 1
    L, LH = pack * d_in, pack * d_hid

    # Row tiling: multiple of 8 sublanes, padded so the grid divides evenly.
    packed_rows = _round_up(rows, pack) // pack
    tile_pr = _round_up(max(int(tile_packed_rows), 8), 8)
    tile_pr = min(tile_pr, _round_up(packed_rows, 8))
    packed_rows_pad = _round_up(packed_rows, tile_pr)
    rows_pad = packed_rows_pad * pack
    grid = (packed_rows_pad // tile_pr,)

    x2d = x.reshape(rows, d_in)
    if rows_pad != rows:
        x2d = jnp.pad(x2d, ((0, rows_pad - rows), (0, 0)))
    xp = x2d.reshape(packed_rows_pad, L)

    # Block-diagonal weights: x_packed @ kron(I_pack, W) == per-row x @ W.
    eye_w = jnp.eye(pack, dtype=w1.dtype)
    w1_bd = jnp.kron(eye_w, w1)                                   # (L, LH)
    w2_bd = jnp.kron(eye_w, w2)                                   # (LH, L)
    # Segment-mean matrix for the LayerNorm statistics.
    seg = jnp.kron(jnp.eye(pack, dtype=jnp.float32),
                   jnp.full((d_in, d_in), 1.0 / d_in, dtype=jnp.float32))

    b1_t = jnp.tile(b1.astype(jnp.float32), pack).reshape(1, LH)
    b2_t = jnp.tile(b2.astype(jnp.float32), pack).reshape(1, L)
    g_t = jnp.tile(gamma.astype(jnp.float32), pack).reshape(1, L)
    beta_t = jnp.tile(beta.astype(jnp.float32), pack).reshape(1, L)

    bytes_x = rows_pad * d_in * x.dtype.itemsize
    param_bytes = ((w1_bd.size + w2_bd.size) * w1.dtype.itemsize
                   + (seg.size + b1_t.size + b2_t.size + g_t.size
                      + beta_t.size) * 4)
    cost = pl.CostEstimate(
        flops=packed_rows_pad * (4 * L * LH + 4 * L * L),
        transcendentals=packed_rows_pad * L,          # rsqrt
        bytes_accessed=2 * bytes_x + param_bytes,
    )

    out_p = pl.pallas_call(
        _ffn_kernel,
        out_shape=jax.ShapeDtypeStruct((packed_rows_pad, L), x.dtype),
        grid_spec=pltpu.PrefetchScalarGridSpec(
            num_scalar_prefetch=0,
            grid=grid,
            in_specs=[
                pl.BlockSpec((tile_pr, L), lambda i: (i, 0)),   # x (streamed)
                pl.BlockSpec((L, LH), lambda i: (0, 0)),        # w1 (resident)
                pl.BlockSpec((1, LH), lambda i: (0, 0)),        # b1
                pl.BlockSpec((LH, L), lambda i: (0, 0)),        # w2
                pl.BlockSpec((1, L), lambda i: (0, 0)),         # b2
                pl.BlockSpec((1, L), lambda i: (0, 0)),         # gamma
                pl.BlockSpec((1, L), lambda i: (0, 0)),         # beta
                pl.BlockSpec((L, L), lambda i: (0, 0)),         # segment-mean
            ],
            out_specs=pl.BlockSpec((tile_pr, L), lambda i: (i, 0)),
        ),
        compiler_params=pltpu.CompilerParams(
            dimension_semantics=("parallel",),
            # Default scoped limit (32 MiB) suffices for the default tile;
            # raised a bit so larger tile sweeps (v6e) don't hit the cap while
            # staying under v7x's 64 MiB physical VMEM.
            vmem_limit_bytes=48 * 1024 * 1024,
        ),
        cost_estimate=cost,
    )(xp, w1_bd, b1_t, w2_bd, b2_t, g_t, beta_t, seg)

    out = out_p.reshape(rows_pad, d_in)[:rows]
    return out.reshape(B, T, d_in)


def _reference(x, w1, b1, w2, b2, gamma, beta):
    x32 = x.astype(jnp.float32)
    h = jnp.maximum(x32 @ w1 + b1, 0.0)
    y = h @ w2 + b2 + x32
    mean = jnp.mean(y, axis=-1, keepdims=True)
    var = jnp.mean((y - mean) ** 2, axis=-1, keepdims=True)
    return ((y - mean) * jax.lax.rsqrt(var + 1e-6)) * gamma + beta


if __name__ == "__main__":
    key = jax.random.PRNGKey(0)
    kx, kw1, kb1, kw2, kb2, kx2 = jax.random.split(key, 6)

    d_in, d_hid = 32, 64

    # nn.Linear(d_in, d_hid): weight (d_hid, d_in), bias (d_hid,).  We store
    # the transposed weight (d_in, d_hid) so the kernel computes x @ W.
    w1 = (jax.random.normal(kw1, (d_hid, d_in), dtype=jnp.float32) * 0.05).T
    b1 = jax.random.normal(kb1, (d_hid,), dtype=jnp.float32) * 0.05
    w2 = (jax.random.normal(kw2, (d_in, d_hid), dtype=jnp.float32) * 0.05).T
    b2 = jax.random.normal(kb2, (d_in,), dtype=jnp.float32) * 0.05
    gamma = jnp.ones((d_in,), dtype=jnp.float32)   # LayerNorm weight init
    beta = jnp.zeros((d_in,), dtype=jnp.float32)   # LayerNorm bias init

    # Small shape: batch=2, seq=8, d_in=32, d_hid=64 (exercises the padding
    # path: 16 rows -> 4 packed rows -> padded to one 8-row tile).
    x_small = jax.random.normal(kx, (2, 8, d_in), dtype=jnp.float32)
    out_small = jax.block_until_ready(
        positionwise_feed_forward(x_small, w1, b1, w2, b2, gamma, beta))
    ref_small = _reference(x_small, w1, b1, w2, b2, gamma, beta)
    assert out_small.shape == x_small.shape
    assert jnp.allclose(out_small, ref_small, atol=1e-4, rtol=1e-4), float(
        jnp.max(jnp.abs(out_small - ref_small)))

    # Larger row count: 2048 rows -> 512 packed rows -> grid=(2,), so the
    # pipelined / multi-step (megacore-shardable) path is also exercised.
    x_big = jax.random.normal(kx2, (4, 512, d_in), dtype=jnp.float32)
    out_big = jax.block_until_ready(
        positionwise_feed_forward(x_big, w1, b1, w2, b2, gamma, beta))
    ref_big = _reference(x_big, w1, b1, w2, b2, gamma, beta)
    assert jnp.allclose(out_big, ref_big, atol=1e-4, rtol=1e-4), float(
        jnp.max(jnp.abs(out_big - ref_big)))

    print("KERNEL_OK")
</pallas_src>

<mosaic_0001>
module attributes {stable_mosaic.version = 11 : i64} {
  func.func @_ffn_kernel(%arg0: i32, %arg1: memref<8x128xf32, #tpu.memory_space<vmem>>, %arg2: memref<128x256xf32, #tpu.memory_space<vmem>>, %arg3: memref<1x256xf32, #tpu.memory_space<vmem>>, %arg4: memref<256x128xf32, #tpu.memory_space<vmem>>, %arg5: memref<1x128xf32, #tpu.memory_space<vmem>>, %arg6: memref<1x128xf32, #tpu.memory_space<vmem>>, %arg7: memref<1x128xf32, #tpu.memory_space<vmem>>, %arg8: memref<128x128xf32, #tpu.memory_space<vmem>>, %arg9: memref<8x128xf32, #tpu.memory_space<vmem>>) attributes {dimension_semantics = [#tpu.dimension_semantics<parallel>], iteration_bounds = array<i64: 1>, scalar_prefetch = 0 : i64, scratch_operands = 0 : i64, tpu.core_type = #tpu.core_type<tc>, window_params = [{transform_indices = @transform_0, window_bounds = array<i64: 8, 128>}, {pipeline_mode = #tpu.pipeline_mode<synchronous>, transform_indices = @transform_1, window_bounds = array<i64: 128, 256>}, {pipeline_mode = #tpu.pipeline_mode<synchronous>, transform_indices = @transform_2, window_bounds = array<i64: 1, 256>}, {pipeline_mode = #tpu.pipeline_mode<synchronous>, transform_indices = @transform_3, window_bounds = array<i64: 256, 128>}, {pipeline_mode = #tpu.pipeline_mode<synchronous>, transform_indices = @transform_4, window_bounds = array<i64: 1, 128>}, {pipeline_mode = #tpu.pipeline_mode<synchronous>, transform_indices = @transform_5, window_bounds = array<i64: 1, 128>}, {pipeline_mode = #tpu.pipeline_mode<synchronous>, transform_indices = @transform_6, window_bounds = array<i64: 1, 128>}, {pipeline_mode = #tpu.pipeline_mode<synchronous>, transform_indices = @transform_7, window_bounds = array<i64: 128, 128>}, {transform_indices = @transform_8, window_bounds = array<i64: 8, 128>}]} {
    %c0 = arith.constant 0 : index
    %c0_0 = arith.constant 0 : index
    %0 = vector.load %arg1[%c0, %c0_0] : memref<8x128xf32, #tpu.memory_space<vmem>>, vector<8x128xf32>
    %c0_1 = arith.constant 0 : index
    %c0_2 = arith.constant 0 : index
    %1 = vector.load %arg2[%c0_1, %c0_2] : memref<128x256xf32, #tpu.memory_space<vmem>>, vector<128x256xf32>
    %cst = arith.constant dense<0.000000e+00> : vector<8x256xf32>
    %2 = tpu.matmul %0, %1, %cst {dimension_numbers = #tpu.dot_dimension_numbers<[1], [0], [0], [1], [0, 0, 1, 1], [], []>} : vector<8x128xf32>, vector<128x256xf32>, vector<8x256xf32> -> vector<8x256xf32>
    %c0_3 = arith.constant 0 : index
    %c0_4 = arith.constant 0 : index
    %3 = vector.load %arg3[%c0_3, %c0_4] : memref<1x256xf32, #tpu.memory_space<vmem>>, vector<1x256xf32>
    %4 = vector.broadcast %3 : vector<1x256xf32> to vector<8x256xf32>
    %5 = arith.addf %2, %4 : vector<8x256xf32>
    %cst_5 = arith.constant 0.000000e+00 : f32
    %6 = vector.broadcast %cst_5 : f32 to vector<8x256xf32>
    %7 = arith.maximumf %5, %6 : vector<8x256xf32>
    %c0_6 = arith.constant 0 : index
    %c0_7 = arith.constant 0 : index
    %8 = vector.load %arg4[%c0_6, %c0_7] : memref<256x128xf32, #tpu.memory_space<vmem>>, vector<256x128xf32>
    %cst_8 = arith.constant dense<0.000000e+00> : vector<8x128xf32>
    %9 = tpu.matmul %7, %8, %cst_8 {dimension_numbers = #tpu.dot_dimension_numbers<[1], [0], [0], [1], [0, 0, 1, 1], [], []>} : vector<8x256xf32>, vector<256x128xf32>, vector<8x128xf32> -> vector<8x128xf32>
    %c0_9 = arith.constant 0 : index
    %c0_10 = arith.constant 0 : index
    %10 = vector.load %arg5[%c0_9, %c0_10] : memref<1x128xf32, #tpu.memory_space<vmem>>, vector<1x128xf32>
    %11 = vector.broadcast %10 : vector<1x128xf32> to vector<8x128xf32>
    %12 = arith.addf %9, %11 : vector<8x128xf32>
    %13 = arith.addf %12, %0 : vector<8x128xf32>
    %c0_11 = arith.constant 0 : index
    %c0_12 = arith.constant 0 : index
    %14 = vector.load %arg8[%c0_11, %c0_12] : memref<128x128xf32, #tpu.memory_space<vmem>>, vector<128x128xf32>
    %cst_13 = arith.constant dense<0.000000e+00> : vector<8x128xf32>
    %15 = tpu.matmul %13, %14, %cst_13 {dimension_numbers = #tpu.dot_dimension_numbers<[1], [0], [0], [1], [0, 0, 1, 1], [], []>} : vector<8x128xf32>, vector<128x128xf32>, vector<8x128xf32> -> vector<8x128xf32>
    %16 = arith.mulf %13, %13 : vector<8x128xf32>
    %c0_14 = arith.constant 0 : index
    %c0_15 = arith.constant 0 : index
    %17 = vector.load %arg8[%c0_14, %c0_15] : memref<128x128xf32, #tpu.memory_space<vmem>>, vector<128x128xf32>
    %cst_16 = arith.constant dense<0.000000e+00> : vector<8x128xf32>
    %18 = tpu.matmul %16, %17, %cst_16 {dimension_numbers = #tpu.dot_dimension_numbers<[1], [0], [0], [1], [0, 0, 1, 1], [], []>} : vector<8x128xf32>, vector<128x128xf32>, vector<8x128xf32> -> vector<8x128xf32>
    %19 = arith.mulf %15, %15 : vector<8x128xf32>
    %20 = arith.subf %18, %19 : vector<8x128xf32>
    %cst_17 = arith.constant 0.000000e+00 : f32
    %21 = vector.broadcast %cst_17 : f32 to vector<8x128xf32>
    %22 = arith.maximumf %20, %21 : vector<8x128xf32>
    %23 = arith.subf %13, %15 : vector<8x128xf32>
    %cst_18 = arith.constant 9.99999997E-7 : f32
    %24 = vector.broadcast %cst_18 : f32 to vector<8x128xf32>
    %25 = arith.addf %22, %24 : vector<8x128xf32>
    %26 = math.rsqrt %25 : vector<8x128xf32>
    %27 = arith.mulf %23, %26 : vector<8x128xf32>
    %c0_19 = arith.constant 0 : index
    %c0_20 = arith.constant 0 : index
    %28 = vector.load %arg6[%c0_19, %c0_20] : memref<1x128xf32, #tpu.memory_space<vmem>>, vector<1x128xf32>
    %29 = vector.broadcast %28 : vector<1x128xf32> to vector<8x128xf32>
    %30 = arith.mulf %27, %29 : vector<8x128xf32>
    %c0_21 = arith.constant 0 : index
    %c0_22 = arith.constant 0 : index
    %31 = vector.load %arg7[%c0_21, %c0_22] : memref<1x128xf32, #tpu.memory_space<vmem>>, vector<1x128xf32>
    %32 = vector.broadcast %31 : vector<1x128xf32> to vector<8x128xf32>
    %33 = arith.addf %30, %32 : vector<8x128xf32>
    %c0_23 = arith.constant 0 : index
    %c0_24 = arith.constant 0 : index
    %34 = vector.load %arg9[%c0_23, %c0_24] : memref<8x128xf32, #tpu.memory_space<vmem>>, vector<8x128xf32>
    tpu.vector_store %arg9[%c0_23, %c0_24], %33 {strides = array<i32>} : memref<8x128xf32, #tpu.memory_space<vmem>>, vector<8x128xf32>,
    return
  }
  func.func @transform_0(%arg0: i32) -> (i32, i32) {
    %c0_i32 = arith.constant 0 : i32
    %c0_i32_0 = arith.constant 0 : i32
    return %arg0, %c0_i32 : i32, i32
  }
  func.func @transform_1(%arg0: i32) -> (i32, i32) {
    %c0_i32 = arith.constant 0 : i32
    %c0_i32_0 = arith.constant 0 : i32
    %c0_i32_1 = arith.constant 0 : i32
    return %c0_i32, %c0_i32_0 : i32, i32
  }
  func.func @transform_2(%arg0: i32) -> (i32, i32) {
    %c0_i32 = arith.constant 0 : i32
    %c0_i32_0 = arith.constant 0 : i32
    %c0_i32_1 = arith.constant 0 : i32
    return %c0_i32, %c0_i32_0 : i32, i32
  }
  func.func @transform_3(%arg0: i32) -> (i32, i32) {
    %c0_i32 = arith.constant 0 : i32
    %c0_i32_0 = arith.constant 0 : i32
    %c0_i32_1 = arith.constant 0 : i32
    return %c0_i32, %c0_i32_0 : i32, i32
  }
  func.func @transform_4(%arg0: i32) -> (i32, i32) {
    %c0_i32 = arith.constant 0 : i32
    %c0_i32_0 = arith.constant 0 : i32
    %c0_i32_1 = arith.constant 0 : i32
    return %c0_i32, %c0_i32_0 : i32, i32
  }
  func.func @transform_5(%arg0: i32) -> (i32, i32) {
    %c0_i32 = arith.constant 0 : i32
    %c0_i32_0 = arith.constant 0 : i32
    %c0_i32_1 = arith.constant 0 : i32
    return %c0_i32, %c0_i32_0 : i32, i32
  }
  func.func @transform_6(%arg0: i32) -> (i32, i32) {
    %c0_i32 = arith.constant 0 : i32
    %c0_i32_0 = arith.constant 0 : i32
    %c0_i32_1 = arith.constant 0 : i32
    return %c0_i32, %c0_i32_0 : i32, i32
  }
  func.func @transform_7(%arg0: i32) -> (i32, i32) {
    %c0_i32 = arith.constant 0 : i32
    %c0_i32_0 = arith.constant 0 : i32
    %c0_i32_1 = arith.constant 0 : i32
    return %c0_i32, %c0_i32_0 : i32, i32
  }
  func.func @transform_8(%arg0: i32) -> (i32, i32) {
    %c0_i32 = arith.constant 0 : i32
    %c0_i32_0 = arith.constant 0 : i32
    return %arg0, %c0_i32 : i32, i32
  }
}

</mosaic_0001>

<bundles_post_ra>
// kernel: tpu_custom_call.1
= control target key start
LH: loop header
LB: loop body
LE: loop exit
PB: predicated region body
PF: predicated region fallthrough
CT: control target
= control target key end

     0   :  { %13 = vsyncpa [#allocation3], 0  ;;  %s1047_s0 = inlined_call_operand.hbm [shape: f32[8,128], index: 0, kind: input, shape index: {}]   ;;  %s1048_s1 = inlined_call_operand.hbm [shape: f32[128,256], index: 1, kind: input, shape index: {}]   ;;  %s1049_s2 = inlined_call_operand.vmem [shape: f32[1,256], index: 2, kind: input, shape index: {}]   ;;  %s1050_s3 = inlined_call_operand.hbm [shape: f32[256,128], index: 3, kind: input, shape index: {}]   ;;  %s1051_s4 = inlined_call_operand.vmem [shape: f32[1,128], index: 4, kind: input, shape index: {}]   ;;  %s1052_s5 = inlined_call_operand.vmem [shape: f32[1,128], index: 5, kind: input, shape index: {}]   ;;  %s1053_s6 = inlined_call_operand.vmem [shape: f32[1,128], index: 6, kind: input, shape index: {}]   ;;  %s1054_s7 = inlined_call_operand.hbm [shape: f32[128,128], index: 7, kind: input, shape index: {}]   ;;  %s1055_s8 = inlined_call_operand.hbm [shape: f32[8,128], index: 8, kind: output, shape index: {}]  }
   0x1   :  { %14 = vsyncpa [#allocation6], 0 }
   0x2   :  { %15 = vsyncpa [#allocation9], 0 }
   0x3   :  { %16 = vsyncpa [#allocation4], 0  ;;  %s895_s27 = smov [#allocation5]   ;;  %s777_s9 = scalar_lea.hbm %s1048_s1, 4096 }
   0x4   :  { %s32_s28 = sshll.u32 %s895_s27, 4  ;;  %p778_p0 = scmp.ne.s32.totalorder %s1048_s1, %s777_s9  ;;  %s33_s28 = int_to_ptr.vmem [resolvable:$true] %s32_s28 }
   0x5   :  { %p781_p1 = scmp.lt.u32.totalorder %s777_s9, %s1048_s1 }
   0x7   :  { %p783_p2 = pnand %p781_p1, %p778_p0 }
   0x9   :  { %786 = shalt.err (!%p783_p2)
}
   0xa   :  { %s787_s14 = scalar_lea.vmem %s33_s28, 4096  ;;  %p792_p4 = scmp.lt.s32.totalorder %s33_s28, %s33_s28 }
   0xb   :  { %p788_p3 = scmp.ne.s32.totalorder %s33_s28, %s787_s14  ;;  %p793_p5 = scmp.lt.s32.totalorder %s787_s14, %s787_s14 }
   0xd   :  { %p794_p6 = por %p793_p5, %p792_p4 }
   0xf   :  { %p795_p7 = pnand %p794_p6, %p788_p3 }
  0x11   :  { %798 = shalt.err (!%p795_p7)
}
  0x12   :  { %s896_s15 = smov 256   ;;  %s897_s16 = smov 16  }
  0x13   :  { %38 = dma.hbm_to_vmem [thread:$0]  %s1048_s1, 4096, %s33_s28, [#allocation6], %s896_s15, %s896_s15, %s897_s16  }
  0x14   :  { %s898_s19 = smov [#allocation2]   ;;  %s899_s21 = smov [#allocation7]  }
  0x15   :  { %s23_s20 = sshll.u32 %s898_s19, 4  ;;  %s46_s22 = sshll.u32 %s899_s21, 4  ;;  %s24_s20 = int_to_ptr.vmem [resolvable:$true] %s23_s20  ;;  %s47_s22 = int_to_ptr.vmem [resolvable:$true] %s46_s22 }
  0x16   :  { %s799_s25 = scalar_lea.hbm %s1047_s0, 128 }
  0x17   :  { %p800_p8 = scmp.ne.s32.totalorder %s1047_s0, %s799_s25  ;;  %p803_p9 = scmp.lt.u32.totalorder %s799_s25, %s1047_s0 }
  0x19   :  { %p805_p10 = pnand %p803_p9, %p800_p8 }
  0x1b   :  { %808 = shalt.err (!%p805_p10)
}
  0x1c   :  { %s809_s1 = scalar_lea.vmem %s24_s20, 128  ;;  %p814_p12 = scmp.lt.s32.totalorder %s24_s20, %s24_s20 }
  0x1d   :  { %p810_p11 = scmp.ne.s32.totalorder %s24_s20, %s809_s1  ;;  %p815_p13 = scmp.lt.s32.totalorder %s809_s1, %s809_s1 }
  0x1f   :  { %p816_p0 = por %p815_p13, %p814_p12 }
  0x21   :  { %p817_p1 = pnand %p816_p0, %p810_p11 }
  0x23   :  { %820 = shalt.err (!%p817_p1)
}
  0x24   :  { %26 = dma.hbm_to_vmem [thread:$0]  %s1047_s0, 128, %s24_s20, [#allocation3]  }
  0x25   :  { %s821_s12 = scalar_lea.hbm %s1050_s3, 4096 }
  0x26   :  { %p822_p2 = scmp.ne.s32.totalorder %s1050_s3, %s821_s12  ;;  %p825_p3 = scmp.lt.u32.totalorder %s821_s12, %s1050_s3 }
  0x28   :  { %p827_p4 = pnand %p825_p3, %p822_p2 }
  0x2a   :  { %830 = shalt.err (!%p827_p4)
}
  0x2b   :  { %s831_s17 = scalar_lea.vmem %s47_s22, 4096  ;;  %p836_p6 = scmp.lt.s32.totalorder %s47_s22, %s47_s22 }
  0x2c   :  { %p832_p5 = scmp.ne.s32.totalorder %s47_s22, %s831_s17  ;;  %p837_p7 = scmp.lt.s32.totalorder %s831_s17, %s831_s17 }
  0x2e   :  { %p838_p8 = por %p837_p7, %p836_p6 }
  0x30   :  { %p839_p9 = pnand %p838_p8, %p832_p5 }
  0x32   :  { %842 = shalt.err (!%p839_p9)
}
  0x33   :  { %s900_s0 = smov 128   ;;  %s901_s18 = smov 8  }
  0x34   :  { %52 = dma.hbm_to_vmem [thread:$0]  %s1050_s3, 4096, %s47_s22, [#allocation6], %s900_s0, %s900_s0, %s901_s18  }
  0x35   :  { %s902_s21 = smov [#allocation8]   ;;  %s843_s26 = scalar_lea.hbm %s1054_s7, 2048 }
  0x36   :  { %s64_s23 = sshll.u32 %s902_s21, 4  ;;  %p844_p10 = scmp.ne.s32.totalorder %s1054_s7, %s843_s26  ;;  %s65_s23 = int_to_ptr.vmem [resolvable:$true] %s64_s23 }
  0x37   :  { %p847_p11 = scmp.lt.u32.totalorder %s843_s26, %s1054_s7 }
  0x39   :  { %p849_p12 = pnand %p847_p11, %p844_p10 }
  0x3b   :  { %852 = shalt.err (!%p849_p12)
}
  0x3c   :  { %s853_s28 = scalar_lea.vmem %s65_s23, 2048  ;;  %p858_p0 = scmp.lt.s32.totalorder %s65_s23, %s65_s23 }
  0x3d   :  { %p854_p13 = scmp.ne.s32.totalorder %s65_s23, %s853_s28  ;;  %p859_p1 = scmp.lt.s32.totalorder %s853_s28, %s853_s28 }
  0x3f   :  { %p860_p2 = por %p859_p1, %p858_p0 }
  0x41   :  { %p861_p3 = pnand %p860_p2, %p854_p13 }
  0x43   :  { %864 = shalt.err (!%p861_p3)
}
  0x44   :  { %70 = dma.hbm_to_vmem [thread:$0]  %s1054_s7, 2048, %s65_s23, [#allocation9], %s900_s0, %s900_s0, %s901_s18  }
  0x45   :  { %887 = dma.done.wait [#allocation3], 128  }
  0x46   :  { %888 = vsyncadd [#allocation3], 4294967168 }
  0x47   :  { %889 = dma.done.wait [#allocation6], 8192  }
  0x48   :  { %890 = vsyncadd [#allocation6], 4294959104 }
  0x49   :  { %891 = dma.done.wait [#allocation9], 2048  }
  0x4a   :  { %892 = vsyncadd [#allocation9], 4294965248  ;;  %v903_v0 = vmov 0.0   ;;  %v85_v1 = vld [vmem:[#allocation5 + $0x8] sm:$0xff]  ;;  %v87_v2 = vld [vmem:[#allocation5 + $0x18] sm:$0xff]  ;;  %vm905_vm0 = vmmov 0  }
  0x4b   :  { %192 = vmatprep.mubr.f32.mxu0 %v903_v0  ;;  %v84_v3 = vld [vmem:[#allocation5] sm:$0xff]  ;;  %v651_v4 = vpack.c.bf16 %v87_v2, %v85_v1  ;;  %v86_v5 = vld [vmem:[#allocation5 + $0x10] sm:$0xff]  ;;  %v89_v6 = vld [vmem:[#allocation5 + $0x28] sm:$0xff]  ;;  %s906_s14 = smov [#allocation10]  }
  0x4c   :  { %v91_v7 = vld [vmem:[#allocation5 + $0x38] sm:$0xff]  ;;  %v653_v8 = vpack.c.bf16 %v86_v5, %v84_v3  ;;  %v88_v10 = vld [vmem:[#allocation5 + $0x20] sm:$0xff]  ;;  %v90_v11 = vld [vmem:[#allocation5 + $0x30] sm:$0xff]  ;;  %s498_s15 = sshll.u32 %s906_s14, 4  ;;  %s499_s15 = int_to_ptr.vmem [resolvable:$true] %s498_s15 }
  0x4d   :  { %v655_v9 = vpack.c.bf16 %v91_v7, %v89_v6  ;;  %v93_v12 = vld [vmem:[#allocation5 + $0x48] sm:$0xff]  ;;  %652 = vmatprep.subr.bf16.mxu0 %v651_v4  ;;  %v95_v13 = vld [vmem:[#allocation5 + $0x58] sm:$0xff]  ;;  %v657_v14 = vpack.c.bf16 %v90_v11, %v88_v10  ;;  %v92_v16 = vld [vmem:[#allocation5 + $0x40] sm:$0xff]  ;;  %s865_s16 = scalar_lea.vmem %s499_s15, 128  ;;  %p870_p5 = scmp.lt.s32.totalorder %s499_s15, %s499_s15 }
  0x4e   :  { %654 = vmatpush1.bf16.msra.mxu0 %v653_v8  ;;  %v659_v15 = vpack.c.bf16 %v95_v13, %v93_v12  ;;  %v94_v17 = vld [vmem:[#allocation5 + $0x50] sm:$0xff]  ;;  %v97_v18 = vld [vmem:[#allocation5 + $0x68] sm:$0xff]  ;;  %v99_v19 = vld [vmem:[#allocation5 + $0x78] sm:$0xff]  ;;  %p866_p4 = scmp.ne.s32.totalorder %s499_s15, %s865_s16  ;;  %p871_p6 = scmp.lt.s32.totalorder %s865_s16, %s865_s16 }
  0x4f   :  { %656 = vmatprep.subr.bf16.mxu0 %v655_v9  ;;  %v661_v20 = vpack.c.bf16 %v94_v17, %v92_v16  ;;  %v663_v21 = vpack.c.bf16 %v99_v19, %v97_v18  ;;  %v96_v22 = vld [vmem:[#allocation5 + $0x60] sm:$0xff]  ;;  %v98_v23 = vld [vmem:[#allocation5 + $0x70] sm:$0xff]  ;;  %v101_v24 = vld [vmem:[#allocation5 + $0x88] sm:$0xff] }
  0x50   :  { %v103_v25 = vld [vmem:[#allocation5 + $0x98] sm:$0xff]  ;;  %v100_v26 = vld [vmem:[#allocation5 + $0x80] sm:$0xff]  ;;  %v102_v27 = vld [vmem:[#allocation5 + $0x90] sm:$0xff]  ;;  %v665_v31 = vpack.c.bf16 %v98_v23, %v96_v22  ;;  %p872_p7 = por %p871_p6, %p870_p5 }
  0x51   :  { %v217_v28 = vld [vmem:[#allocation7 + $0x80] sm:$0xff]  ;;  %v218_v29 = vld [vmem:[#allocation7 + $0x88] sm:$0xff]  ;;  %v219_v34 = vld [vmem:[#allocation7 + $0x90] sm:$0xff]  ;;  %v667_v36 = vpack.c.bf16 %v103_v25, %v101_v24  ;;  %v669_v46 = vpack.c.bf16 %v102_v27, %v100_v26 }
  0x52   :  { %658 = vmatpush1.bf16.msra.mxu0 %v657_v14  ;;  %v201_v30 = vld [vmem:[#allocation7] sm:$0xff]  ;;  %v683_v32 = vpack.c.bf16 %v218_v29, %v217_v28  ;;  %v202_v33 = vld [vmem:[#allocation7 + $0x8] sm:$0xff]  ;;  %v220_v35 = vld [vmem:[#allocation7 + $0x98] sm:$0xff]  ;;  %p873_p8 = pnand %p872_p7, %p866_p4 }
  0x53   :  { %660 = vmatprep.subr.bf16.mxu0 %v659_v15  ;;  %v685_v37 = vpack.c.bf16 %v202_v33, %v201_v30  ;;  %v687_v38 = vpack.c.bf16 %v220_v35, %v219_v34  ;;  %v203_v39 = vld [vmem:[#allocation7 + $0x10] sm:$0xff]  ;;  %v204_v40 = vld [vmem:[#allocation7 + $0x18] sm:$0xff]  ;;  %v221_v41 = vld [vmem:[#allocation7 + $0xa0] sm:$0xff] }
  0x54   :  { %v105_v42 = vld [vmem:[#allocation5 + $0xa8] sm:$0xff]  ;;  %v107_v43 = vld [vmem:[#allocation5 + $0xb8] sm:$0xff]  ;;  %684 = vmatprep.subr.bf16.mxu1 %v683_v32  ;;  %v689_v45 = vpack.c.bf16 %v204_v40, %v203_v39  ;;  %v104_v47 = vld [vmem:[#allocation5 + $0xa0] sm:$0xff] }
  0x55   :  { %v222_v44 = vld [vmem:[#allocation7 + $0xa8] sm:$0xff]  ;;  %686 = vmatpush3.bf16.msra.mxu1 %v685_v37  ;;  %v205_v49 = vld [vmem:[#allocation7 + $0x20] sm:$0xff]  ;;  %v671_v51 = vpack.c.bf16 %v107_v43, %v105_v42  ;;  %v106_v52 = vld [vmem:[#allocation5 + $0xb0] sm:$0xff]  ;;  %v904_v37 = vmov 0.0|0.0  }
  0x56   :  { %662 = vmatpush1.bf16.msra.mxu0 %v661_v20  ;;  %688 = vmatprep.subr.bf16.mxu1 %v687_v38  ;;  %v691_v48 = vpack.c.bf16 %v222_v44, %v221_v41  ;;  %v206_v50 = vld [vmem:[#allocation7 + $0x28] sm:$0xff]  ;;  %v223_v53 = vld [vmem:[#allocation7 + $0xb0] sm:$0xff]  ;;  %v224_v54 = vld [vmem:[#allocation7 + $0xb8] sm:$0xff]  ;;  %v673_v58 = vpack.c.bf16 %v106_v52, %v104_v47 }
  0x57   :  { %664 = vmatprep.subr.bf16.mxu0 %v663_v21  ;;  %v109_v55 = vld [vmem:[#allocation5 + $0xc8] sm:$0xff]  ;;  %v111_v56 = vld [vmem:[#allocation5 + $0xd8] sm:$0xff]  ;;  %v693_v57 = vpack.c.bf16 %v206_v50, %v205_v49  ;;  %v108_v59 = vld [vmem:[#allocation5 + $0xc0] sm:$0xff]  ;;  %v695_v60 = vpack.c.bf16 %v224_v54, %v223_v53  ;;  %v118_v54 = vlaneseq }
  0x58   :  { %v207_v61 = vld [vmem:[#allocation7 + $0x30] sm:$0xff]  ;;  %v208_v62 = vld [vmem:[#allocation7 + $0x38] sm:$0xff]  ;;  %v675_v63 = vpack.c.bf16 %v111_v56, %v109_v55  ;;  %v225_v2 = vld [vmem:[#allocation7 + $0xc0] sm:$0xff] }
  0x59   :  { %690 = vmatpush3.bf16.msra.mxu1 %v689_v45  ;;  %v110_v1 = vld [vmem:[#allocation5 + $0xd0] sm:$0xff]  ;;  %v226_v3 = vld [vmem:[#allocation7 + $0xc8] sm:$0xff]  ;;  %v115_v5 = vld [vmem:[#allocation5 + $0xf8] sm:$0xff]  ;;  %v697_v6 = vpack.c.bf16 %v208_v62, %v207_v61  ;;  %v119_v55 = vshrl.u32 %v118_v54, 7 }
  0x5a   :  { %666 = vmatpush1.bf16.msra.mxu0 %v665_v31  ;;  %692 = vmatprep.subr.bf16.mxu1 %v691_v48  ;;  %v113_v4 = vld [vmem:[#allocation5 + $0xe8] sm:$0xff]  ;;  %v677_v7 = vpack.c.bf16 %v110_v1, %v108_v59  ;;  %v112_v8 = vld [vmem:[#allocation5 + $0xe0] sm:$0xff]  ;;  %v699_v9 = vpack.c.bf16 %v226_v3, %v225_v2  ;;  %v114_v13 = vld [vmem:[#allocation5 + $0xf0] sm:$0xff] }
  0x5b   :  { %668 = vmatprep.subr.bf16.mxu0 %v667_v36  ;;  %v209_v10 = vld [vmem:[#allocation7 + $0x40] sm:$0xff]  ;;  %v210_v11 = vld [vmem:[#allocation7 + $0x48] sm:$0xff]  ;;  %v679_v12 = vpack.c.bf16 %v115_v5, %v113_v4  ;;  %v227_v14 = vld [vmem:[#allocation7 + $0xd0] sm:$0xff]  ;;  %v681_v17 = vpack.c.bf16 %v114_v13, %v112_v8  ;;  %v120_v56 = vsub.s32 0, %v119_v55 }
  0x5c   :  { %v228_v15 = vld [vmem:[#allocation7 + $0xd8] sm:$0xff]  ;;  %v701_v16 = vpack.c.bf16 %v210_v11, %v209_v10  ;;  %v211_v19 = vld [vmem:[#allocation7 + $0x50] sm:$0xff]  ;;  %v229_v21 = vld [vmem:[#allocation7 + $0xe0] sm:$0xff] }
  0x5d   :  { %694 = vmatpush3.bf16.msra.mxu1 %v693_v57  ;;  %v703_v18 = vpack.c.bf16 %v228_v15, %v227_v14  ;;  %v212_v20 = vld [vmem:[#allocation7 + $0x58] sm:$0xff]  ;;  %v230_v22 = vld [vmem:[#allocation7 + $0xe8] sm:$0xff]  ;;  %v213_v26 = vld [vmem:[#allocation7 + $0x60] sm:$0xff] }
  0x5e   :  { %670 = vmatpush1.bf16.msra.mxu0 %v669_v46  ;;  %696 = vmatprep.subr.bf16.mxu1 %v695_v60  ;;  %v705_v23 = vpack.c.bf16 %v212_v20, %v211_v19  ;;  %v1001_v24 = vld [vmem:[#allocation2] sm:$0xff]  ;;  %v707_v25 = vpack.c.bf16 %v230_v22, %v229_v21  ;;  %v214_v27 = vld [vmem:[#allocation7 + $0x68] sm:$0xff]  ;;  %v231_v29 = vld [vmem:[#allocation7 + $0xf0] sm:$0xff] }
  0x5f   :  { %672 = vmatprep.subr.bf16.mxu0 %v671_v51  ;;  %v709_v28 = vpack.c.bf16 %v214_v27, %v213_v26  ;;  %v232_v30 = vld [vmem:[#allocation7 + $0xf8] sm:$0xff]  ;;  %v215_v32 = vld [vmem:[#allocation7 + $0x70] sm:$0xff]  ;;  %v311_v35 = vld [vmem:[#allocation8] sm:$0xff] }
  0x60   :  { %v711_v31 = vpack.c.bf16 %v232_v30, %v231_v29  ;;  %v216_v33 = vld [vmem:[#allocation7 + $0x78] sm:$0xff]  ;;  %v312_v36 = vld [vmem:[#allocation8 + $0x8] sm:$0xff]  ;;  %v313_v39 = vld [vmem:[#allocation8 + $0x10] sm:$0xff] }
  0x61   :  { %698 = vmatpush3.bf16.msra.mxu1 %v697_v6  ;;  %v713_v34 = vpack.c.bf16 %v216_v33, %v215_v32  ;;  %v716_v38 = vpack.c.bf16 %v312_v36, %v311_v35  ;;  %v314_v40 = vld [vmem:[#allocation8 + $0x18] sm:$0xff]  ;;  %v315_v42 = vld [vmem:[#allocation8 + $0x20] sm:$0xff]  ;;  %v316_v43 = vld [vmem:[#allocation8 + $0x28] sm:$0xff] }
  0x62   :  { %674 = vmatpush1.bf16.msra.mxu0 %v673_v58  ;;  %700 = vmatprep.subr.bf16.mxu1 %v699_v9  ;;  %v719_v41 = vpack.c.bf16 %v314_v40, %v313_v39  ;;  %v722_v44 = vpack.c.bf16 %v316_v43, %v315_v42  ;;  %v317_v45 = vld [vmem:[#allocation8 + $0x30] sm:$0xff]  ;;  %v318_v46 = vld [vmem:[#allocation8 + $0x38] sm:$0xff]  ;;  %v319_v48 = vld [vmem:[#allocation8 + $0x40] sm:$0xff]  ;;  %v124_v58 = vsub.s32 1, %v119_v55 }
  0x63   :  { %676 = vmatprep.subr.bf16.mxu0 %v675_v63  ;;  %v725_v47 = vpack.c.bf16 %v318_v46, %v317_v45  ;;  %v320_v49 = vld [vmem:[#allocation8 + $0x48] sm:$0xff]  ;;  %v321_v51 = vld [vmem:[#allocation8 + $0x50] sm:$0xff]  ;;  %v322_v52 = vld [vmem:[#allocation8 + $0x58] sm:$0xff] }
  0x64   :  { %v728_v50 = vpack.c.bf16 %v320_v49, %v319_v48  ;;  %v731_v53 = vpack.c.bf16 %v322_v52, %v321_v51  ;;  %v116_v57 = vld [vmem:[%s1049_s2] sm:$0x3]  ;;  %v323_v4 = vld [vmem:[#allocation8 + $0x60] sm:$0xff]  ;;  %v324_v5 = vld [vmem:[#allocation8 + $0x68] sm:$0xff] }
  0x65   :  { %702 = vmatpush3.bf16.msra.mxu1 %v701_v16  ;;  %v121_v59 = vrot.slane %v116_v57, %v120_v56  ;;  %v125_v60 = vrot.slane %v116_v57, %v124_v58  ;;  %v734_v6 = vpack.c.bf16 %v324_v5, %v323_v4  ;;  %v326_v8 = vld [vmem:[#allocation8 + $0x78] sm:$0xff] }
  0x66   :  { %678 = vmatpush1.bf16.msra.mxu0 %v677_v7  ;;  %704 = vmatprep.subr.bf16.mxu1 %v703_v18  ;;  %v325_v7 = vld [vmem:[#allocation8 + $0x70] sm:$0xff]  ;;  %v509_v11 = vld [vmem:[%s1051_s4] ss:$0 sm:$0xff] }
  0x67   :  { %680 = vmatprep.subr.bf16.mxu0 %v679_v12  ;;  %v737_v9 = vpack.c.bf16 %v326_v8, %v325_v7  ;;  %v510_v27 = vld [vmem:[%s1052_s5] ss:$0 sm:$0xff] }
  0x69   :  { %706 = vmatpush3.bf16.msra.mxu1 %v705_v23 }
  0x6a   :  { %682 = vmatpush1.bf16.msra.mxu0 %v681_v17  ;;  %708 = vmatprep.subr.bf16.mxu1 %v707_v25 }
  0x6b   :  { %715 = vmatprep.subr.bf16.mxu0 %v904_v37 }
  0x6d   :  { %193 = vmatmul.mubr.f32.vlgmr.msra.gmra.mrb[0].mxu0 %v1001_v24  ;;  %710 = vmatpush3.bf16.msra.mxu1 %v709_v28 }
  0x6e   :  { %712 = vmatprep.subr.bf16.mxu1 %v711_v31  ;;  %717 = vmatpush3.bf16.msra.mxu0 %v716_v38 }
  0x6f   :  { %718 = vmatprep.subr.bf16.mxu0 %v904_v37  ;;  %613 = vmatprep.mubr.msk.f32.mxu0 %vm905_vm0, %v903_v0 }
  0x71   :  { %714 = vmatpush3.bf16.msra.mxu1 %v713_v34 }
  0x72   :  { %739 = vmatprep.subr.bf16.mxu1 %v904_v37  ;;  %720 = vmatpush3.bf16.msra.mxu0 %v719_v41 }
  0x73   :  { %721 = vmatprep.subr.bf16.mxu0 %v904_v37 }
  0x76   :  { %723 = vmatpush3.bf16.msra.mxu0 %v722_v44 }
  0x77   :  { %724 = vmatprep.subr.bf16.mxu0 %v904_v37 }
  0x7a   :  { %726 = vmatpush3.bf16.msra.mxu0 %v725_v47 }
  0x7b   :  { %727 = vmatprep.subr.bf16.mxu0 %v904_v37 }
  0x7e   :  { %729 = vmatpush3.bf16.msra.mxu0 %v728_v50 }
  0x7f   :  { %730 = vmatprep.subr.bf16.mxu0 %v904_v37 }
  0x82   :  { %732 = vmatpush3.bf16.msra.mxu0 %v731_v53 }
  0x83   :  { %733 = vmatprep.subr.bf16.mxu0 %v904_v37 }
  0x86   :  { %735 = vmatpush3.bf16.msra.mxu0 %v734_v6 }
  0x87   :  { %736 = vmatprep.subr.bf16.mxu0 %v904_v37 }
  0x8a   :  { %738 = vmatpush3.bf16.msra.mxu0 %v737_v9 }
 0x140   :  { %v194_v61 = vpop.f32.mrb[0].mxu0 }
 0x141   :  { %v195_v62 = vadd.f32 %v194_v61, %v121_v59  ;;  %v196_v63 = vpop.f32.mrb[1].mxu0 }
 0x142   :  { %v197_v1 = vadd.f32 %v196_v63, %v125_v60 }
 0x143   :  { %v199_v3 = vmax.f32 %v195_v62, 0.0 }
 0x144   :  { %v200_v2 = vmax.f32 %v197_v1, 0.0 }
 0x146   :  { %304 = vmatprep.mubr.f32.mxu1 %v200_v2 }
 0x147   :  { %305 = vmatmul.mubr.f32.vlgmr.msra.gmra.mrb[0].mxu1 %v199_v3 }
 0x148   :  { %741 = vmatpush3.bf16.msra.mxu1 %v716_v38  ;;  %648 = vmatprep.mubr.msk.f32.mxu1 %vm905_vm0, %v903_v0 }
 0x149   :  { %742 = vmatprep.subr.bf16.mxu1 %v904_v37 }
 0x14c   :  { %744 = vmatpush3.bf16.msra.mxu1 %v719_v41 }
 0x14d   :  { %745 = vmatprep.subr.bf16.mxu1 %v904_v37 }
 0x150   :  { %747 = vmatpush3.bf16.msra.mxu1 %v722_v44 }
 0x151   :  { %748 = vmatprep.subr.bf16.mxu1 %v904_v37 }
 0x154   :  { %750 = vmatpush3.bf16.msra.mxu1 %v725_v47 }
 0x155   :  { %751 = vmatprep.subr.bf16.mxu1 %v904_v37 }
 0x158   :  { %753 = vmatpush3.bf16.msra.mxu1 %v728_v50 }
 0x159   :  { %754 = vmatprep.subr.bf16.mxu1 %v904_v37 }
 0x15c   :  { %756 = vmatpush3.bf16.msra.mxu1 %v731_v53 }
 0x15d   :  { %757 = vmatprep.subr.bf16.mxu1 %v904_v37 }
 0x160   :  { %759 = vmatpush3.bf16.msra.mxu1 %v734_v6 }
 0x161   :  { %760 = vmatprep.subr.bf16.mxu1 %v904_v37 }
 0x164   :  { %762 = vmatpush3.bf16.msra.mxu1 %v737_v9 }
 0x21a   :  { %v544_v10 = vpop.f32.mrb[0].mxu1 }
 0x21b   :  { %v545_v12 = vpop.f32.mrb[1].mxu1 }
 0x21c   :  { %v546_v13 = vadd.f32 %v545_v12, %v544_v10 }
 0x21e   :  { %v307_v14 = vadd.f32 %v546_v13, %v509_v11 }
 0x220   :  { %v310_v15 = vadd.f32 %v307_v14, %v1001_v24  ;;  %v511_v24 = vld [vmem:[%s1053_s6] ss:$0 sm:$0xff] }
 0x222   :  { %614 = vmatmul.mubr.f32.vlgmr.msra.gmra.mrb[2].mxu0 %v310_v15  ;;  %v397_v16 = vmul.f32 %v310_v15, %v310_v15 }
 0x224   :  { %649 = vmatmul.mubr.f32.vlgmr.msra.gmra.mrb[2].mxu1 %v397_v16 }
 0x2f5   :  { %v393_v17 = vpop.f32.mrb[2].mxu0 }
 0x2f6   :  { %v468_v18 = vmul.f32 %v393_v17, %v393_v17  ;;  %v615_v19 = vpop.f32.mrb[3].mxu0  ;;  %v471_v25 = vsub.f32 %v310_v15, %v393_v17 }
 0x2f7   :  { %v464_v20 = vpop.f32.mrb[2].mxu1 }
 0x2f8   :  { %v469_v21 = vsub.f32 %v464_v20, %v468_v18  ;;  %v650_v22 = vpop.f32.mrb[3].mxu1 }
 0x2fa   :  { %v470_v0 = vmax.f32 %v469_v21, 0.0 }
 0x2fc   :  { %v472_v23 = vadd.f32 1e-06, %v470_v0 }
 0x2fe   :  { %775 = vrsqrt.f32 %v472_v23 }
 0x308   :  { %v776_v26 = vpop.eup %775 }
 0x309   :  { %v474_v28 = vmul.f32 %v776_v26, %v471_v25 }
 0x30b   :  { %v482_v29 = vmul.f32 %v510_v27, %v474_v28 }
 0x30d   :  { %v490_v30 = vadd.f32 %v511_v24, %v482_v29 }
 0x30f   :  { %491 = vst [vmem:[#allocation10] sm:$0xff] %v490_v30 }
 0x310   :  { %876 = shalt.err (!%p873_p8)
}
 0x311   :  { %s877_s0 = scalar_lea.hbm %s1055_s8, 128 }
 0x312   :  { %p878_p9 = scmp.ne.s32.totalorder %s1055_s8, %s877_s0  ;;  %p881_p10 = scmp.lt.u32.totalorder %s877_s0, %s1055_s8 }
 0x314   :  { %p883_p11 = pnand %p881_p10, %p878_p9 }
 0x316   :  { %886 = shalt.err (!%p883_p11)
}
 0x317   :  { %501 = dma.vmem_to_hbm [thread:$0]  %s499_s15, 128, %s1055_s8, [#allocation4]  }
 0x318   :  { %893 = dma.done.wait [#allocation4], 128  }
 0x319   :  { %894 = vsyncadd [#allocation4], 4294967168 }
 0x31a   :  { %505 = vsyncpa [#allocation3], 1 }
 0x31b   :  { %506 = vsyncpa [#allocation6], 1 }
 0x31c   :  { %507 = vsyncpa [#allocation9], 1 }
 0x31d   :  { %508 = vsyncpa [#allocation4], 1 }

</bundles_post_ra>
